<compile_context>
chip_gen: v5e
topology: v5e:2x2
jax: 0.10.0
libtpu: 0.0.40
codegen_flags: <defaults>
</compile_context>

<pallas_src>
import functools

import jax
import jax.numpy as jnp
from jax.experimental import pallas as pl
from jax.experimental.pallas import tpu as pltpu


def _round_up(x, m):
    return (x + m - 1) // m * m


def _linear_kernel(x_ref, w_ref, b_ref, o_ref):
    # x_ref: (tm, K) bf16, w_ref: (K, tn) bf16, b_ref: (1, tn) f32,
    # o_ref: (tm, tn).  f32 accumulation on the MXU, f32 epilogue.
    acc = jnp.dot(x_ref[...], w_ref[...], preferred_element_type=jnp.float32)
    o_ref[...] = (acc + b_ref[...]).astype(o_ref.dtype)


def _patch_linear(patches_2d, weight, bias, *, out_dtype,
                  tm_max=512, vmem_budget=24 * 1024 * 1024):
    """patches_2d: (M, K) ; weight: (K, E) ; bias: (E,).  Returns (M, E)."""
    M, K = patches_2d.shape
    E = weight.shape[1]
    out_itemsize = jnp.dtype(out_dtype).itemsize

    # Row tile: MXU-aligned 512 for large M, else the full extent (always a
    # legal block shape).  Grid uses cdiv; the partial edge block is masked by
    # Pallas, so M is never padded / copied.
    tm = tm_max if M >= tm_max else M
    grid_m = pl.cdiv(M, tm)

    # Column tile: lane-dense, preferably the whole (padded) E so the weight is
    # DMA'd into VMEM once and stays resident across every M-tile.
    def vmem_need(tn):
        # double-buffered x, w, out tiles + bias tile.
        return 2 * (tm * K * 2 + K * tn * 2 + tm * tn * out_itemsize + tn * 4)

    Ep = _round_up(E, 128)
    tn = Ep
    for cand in [Ep] + [t for t in (512, 256, 128) if t < Ep]:
        if vmem_need(cand) <= vmem_budget:
            tn = cand
            break
    else:
        tn = 128  # still correct, just smaller tiles
    Ep = _round_up(E, tn)          # tn always divides Ep
    grid_e = Ep // tn

    x_p = patches_2d.astype(jnp.bfloat16)          # no M/K padding
    w_p = weight.astype(jnp.bfloat16)
    b_p = bias.astype(jnp.float32).reshape(1, E)
    if Ep != E:
        w_p = jnp.pad(w_p, ((0, 0), (0, Ep - E)))
        b_p = jnp.pad(b_p, ((0, 0), (0, Ep - E)))

    need = vmem_need(tn)
    vmem_limit = int(min(32 * 1024 * 1024, max(2 * need, 16 * 1024 * 1024)))

    cost = pl.CostEstimate(
        flops=2 * M * K * Ep,
        transcendentals=0,
        bytes_accessed=(M * K * 2 + K * Ep * 2 + Ep * 4 + M * Ep * out_itemsize),
    )

    out = pl.pallas_call(
        _linear_kernel,
        out_shape=jax.ShapeDtypeStruct((M, Ep), out_dtype),
        grid_spec=pltpu.PrefetchScalarGridSpec(
            num_scalar_prefetch=0,
            # E outer / M inner: the weight block index is constant across the
            # inner sweep, so Pallas skips the redundant weight DMA even when
            # grid_e > 1 (and with tn == Ep there is a single weight tile).
            grid=(grid_e, grid_m),
            in_specs=[
                pl.BlockSpec((tm, K), lambda j, i: (i, 0)),   # activations
                pl.BlockSpec((K, tn), lambda j, i: (0, j)),   # weight (resident)
                pl.BlockSpec((1, tn), lambda j, i: (0, j)),   # bias
            ],
            out_specs=pl.BlockSpec((tm, tn), lambda j, i: (i, j)),
        ),
        compiler_params=pltpu.CompilerParams(
            dimension_semantics=("parallel", "parallel"),
            vmem_limit_bytes=vmem_limit,
            # Let XLA fuse the cast/reshape/transpose producer of the
            # activations into the kernel's input DMA (cheap experiment from
            # the perf review; ignored if the fusion pass declines).
            allow_input_fusion=[True, False, False],
        ),
        cost_estimate=cost,
    )(x_p, w_p, b_p)

    return out if Ep == E else out[:, :E]


def patch_embedding(x, weight, bias, *, patch_size, out_dtype=None):
    """x: (B, C, H, W) NCHW.  weight: (K, E) with K = P*P*C in the reference
    (p1, p2, c) feature order (c fastest), i.e. torch Linear weight transposed.
    bias: (E,).  Returns (B, N, E), N = (H//P)*(W//P).
    """
    B, C, H, W = x.shape
    P = patch_size
    assert H % P == 0 and W % P == 0
    h, w = H // P, W // P
    K = C * P * P
    E = weight.shape[1]
    if out_dtype is None:
        out_dtype = x.dtype  # pass jnp.bfloat16 to halve output writeback

    # Patch rearrange in (c, p1, p2) feature order: the innermost copied runs
    # are P contiguous W-elements (vs 1-element runs for the reference
    # (p1, p2, c) order), so the XLA transpose is several-x cheaper.  Cast to
    # bf16 first so it moves half the bytes.
    xb = x.astype(jnp.bfloat16)
    xb = xb.reshape(B, C, h, P, w, P)              # b c h p1 w p2
    xb = jnp.transpose(xb, (0, 2, 4, 1, 3, 5))     # b h w c p1 p2
    patches = xb.reshape(B * h * w, K)             # (M, K), features (c, p1, p2)

    # One-time K-row permutation of the weight from the reference (p1, p2, c)
    # order to (c, p1, p2); K x E, negligible and constant-foldable.
    w_cpp = jnp.transpose(weight.reshape(P, P, C, E), (2, 0, 1, 3)).reshape(K, E)

    out2d = _patch_linear(patches, w_cpp, bias, out_dtype=out_dtype)
    return out2d.reshape(B, h * w, E)


if __name__ == "__main__":
    # Small, self-consistent shapes: B=2, C=4, H=W=16, patch=8 -> N=4, K=256, E=32.
    B, C, H, W = 2, 4, 16, 16
    P = 8
    E = 32
    K = C * P * P

    key = jax.random.PRNGKey(0)
    kx, kw, kb = jax.random.split(key, 3)

    x = jax.random.normal(kx, (B, C, H, W), dtype=jnp.float32)

    # Deterministic nn.Linear-style init: U(-1/sqrt(K), 1/sqrt(K)).
    # PyTorch Linear stores weight as (E, K); we keep it as (K, E) for the kernel,
    # with K rows in the reference (p1, p2, c) order.
    bound = 1.0 / (K ** 0.5)
    weight = jax.random.uniform(kw, (K, E), jnp.float32, -bound, bound)
    bias = jax.random.uniform(kb, (E,), jnp.float32, -bound, bound)

    out = jax.jit(functools.partial(patch_embedding, patch_size=P))(x, weight, bias)
    out = jax.block_until_ready(out)

    # Reference in plain JAX/f32 using the ORIGINAL (p1, p2, c) feature order and
    # un-permuted weight — also cross-checks the in-wrapper weight permutation.
    xr = x.reshape(B, C, H // P, P, W // P, P)
    xr = jnp.transpose(xr, (0, 2, 4, 3, 5, 1)).reshape(B, (H // P) * (W // P), K)
    ref = xr @ weight + bias

    assert out.shape == (B, (H // P) * (W // P), E)
    # Tolerance sized for bf16 matmul operands with f32 accumulation.
    assert jnp.allclose(out, ref, atol=3e-2, rtol=0), float(jnp.max(jnp.abs(out - ref)))

    print("KERNEL_OK")
</pallas_src>

<mosaic_0001>
module attributes {stable_mosaic.version = 11 : i64} {
  func.func @_linear_kernel(%arg0: i32, %arg1: i32, %arg2: memref<8x256xbf16, #tpu.memory_space<vmem>>, %arg3: memref<256x128xbf16, #tpu.memory_space<vmem>>, %arg4: memref<1x128xf32, #tpu.memory_space<vmem>>, %arg5: memref<8x128xf32, #tpu.memory_space<vmem>>) attributes {dimension_semantics = [#tpu.dimension_semantics<parallel>, #tpu.dimension_semantics<parallel>], iteration_bounds = array<i64: 1, 1>, scalar_prefetch = 0 : i64, scratch_operands = 0 : i64, tpu.core_type = #tpu.core_type<tc>, window_params = [{transform_indices = @transform_0, window_bounds = array<i64: 8, 256>}, {transform_indices = @transform_1, window_bounds = array<i64: 256, 128>}, {transform_indices = @transform_2, window_bounds = array<i64: 1, 128>}, {transform_indices = @transform_3, window_bounds = array<i64: 8, 128>}]} {
    %c0 = arith.constant 0 : index
    %c0_0 = arith.constant 0 : index
    %0 = vector.load %arg2[%c0, %c0_0] : memref<8x256xbf16, #tpu.memory_space<vmem>>, vector<8x256xbf16>
    %c0_1 = arith.constant 0 : index
    %c0_2 = arith.constant 0 : index
    %1 = vector.load %arg3[%c0_1, %c0_2] : memref<256x128xbf16, #tpu.memory_space<vmem>>, vector<256x128xbf16>
    %cst = arith.constant dense<0.000000e+00> : vector<8x128xf32>
    %2 = tpu.matmul %0, %1, %cst {dimension_numbers = #tpu.dot_dimension_numbers<[1], [0], [0], [1], [0, 0, 1, 1], [], []>} : vector<8x256xbf16>, vector<256x128xbf16>, vector<8x128xf32> -> vector<8x128xf32>
    %c0_3 = arith.constant 0 : index
    %c0_4 = arith.constant 0 : index
    %3 = vector.load %arg4[%c0_3, %c0_4] : memref<1x128xf32, #tpu.memory_space<vmem>>, vector<1x128xf32>
    %4 = vector.broadcast %3 : vector<1x128xf32> to vector<8x128xf32>
    %5 = arith.addf %2, %4 : vector<8x128xf32>
    %c0_5 = arith.constant 0 : index
    %c0_6 = arith.constant 0 : index
    %6 = vector.load %arg5[%c0_5, %c0_6] : memref<8x128xf32, #tpu.memory_space<vmem>>, vector<8x128xf32>
    tpu.vector_store %arg5[%c0_5, %c0_6], %5 {strides = array<i32>} : memref<8x128xf32, #tpu.memory_space<vmem>>, vector<8x128xf32>,
    return
  }
  func.func @transform_0(%arg0: i32, %arg1: i32) -> (i32, i32) {
    %c0_i32 = arith.constant 0 : i32
    %c0_i32_0 = arith.constant 0 : i32
    return %arg1, %c0_i32 : i32, i32
  }
  func.func @transform_1(%arg0: i32, %arg1: i32) -> (i32, i32) {
    %c0_i32 = arith.constant 0 : i32
    %c0_i32_0 = arith.constant 0 : i32
    return %c0_i32, %arg0 : i32, i32
  }
  func.func @transform_2(%arg0: i32, %arg1: i32) -> (i32, i32) {
    %c0_i32 = arith.constant 0 : i32
    %c0_i32_0 = arith.constant 0 : i32
    return %c0_i32, %arg0 : i32, i32
  }
  func.func @transform_3(%arg0: i32, %arg1: i32) -> (i32, i32) {
    %c0_i32 = arith.constant 0 : i32
    return %arg1, %arg0 : i32, i32
  }
}

</mosaic_0001>

<bundles_post_ra>
// kernel: patch_embedding.1
= control target key start
LH: loop header
LB: loop body
LE: loop exit
PB: predicated region body
PF: predicated region fallthrough
CT: control target
= control target key end

     0   :  { %s384_s0 = inlined_call_operand.vmem [shape: bf16[8,256], index: 0, kind: input, shape index: {}]   ;;  %s385_s1 = inlined_call_operand.vmem [shape: bf16[256,128], index: 1, kind: input, shape index: {}]   ;;  %s386_s2 = inlined_call_operand.vmem [shape: f32[1,128], index: 2, kind: input, shape index: {}]   ;;  %s387_s3 = inlined_call_operand.hbm [shape: f32[8,128], index: 3, kind: output, shape index: {}]  }
   0x1   :  { %v269_v0 = vld [vmem:[%s385_s1 + $0x38] sm:$0xff]  ;;  %v268_v2 = vld [vmem:[%s385_s1 + $0x30] sm:$0xff]  ;;  %v267_v4 = vld [vmem:[%s385_s1 + $0x28] sm:$0xff] }
   0x2   :  { %v277_v1 = vld [vmem:[%s385_s1 + $0x78] sm:$0xff]  ;;  %155 = vmatpush.bf16.msra.mxu0 %v269_v0  ;;  %v276_v3 = vld [vmem:[%s385_s1 + $0x70] sm:$0xff]  ;;  %v275_v5 = vld [vmem:[%s385_s1 + $0x68] sm:$0xff] }
   0x3   :  { %168 = vmatpush.bf16.msra.mxu1 %v277_v1 }
   0x6   :  { %156 = vmatpush.bf16.msra.mxu0 %v268_v2 }
   0x7   :  { %169 = vmatpush.bf16.msra.mxu1 %v276_v3 }
   0x8   :  { %8 = vsyncpa [#allocation3], 0  ;;  %v266_v6 = vld [vmem:[%s385_s1 + $0x20] sm:$0xff]  ;;  %v265_v8 = vld [vmem:[%s385_s1 + $0x18] sm:$0xff]  ;;  %s306_s20 = smov [#allocation2]   ;;  %s189_s24 = sshll.u32 %s387_s3, 4  ;;  %s190_s24 = int_to_ptr.hbm [resolvable:$true] %s189_s24 }
   0x9   :  { %v274_v7 = vld [vmem:[%s385_s1 + $0x60] sm:$0xff]  ;;  %v273_v9 = vld [vmem:[%s385_s1 + $0x58] sm:$0xff]  ;;  %v264_v10 = vld [vmem:[%s385_s1 + $0x10] sm:$0xff]  ;;  %s187_s21 = sshll.u32 %s306_s20, 4  ;;  %s188_s21 = int_to_ptr.vmem [resolvable:$true] %s187_s21 }
   0xa   :  { %157 = vmatpush.bf16.msra.mxu0 %v267_v4  ;;  %v272_v11 = vld [vmem:[%s385_s1 + $0x50] sm:$0xff]  ;;  %v263_v12 = vld [vmem:[%s385_s1 + $0x8] sm:$0xff]  ;;  %v15_v14 = vld [vmem:[%s384_s0] sm:$0xff] }
   0xb   :  { %170 = vmatpush.bf16.msra.mxu1 %v275_v5  ;;  %v271_v13 = vld [vmem:[%s385_s1 + $0x48] sm:$0xff]  ;;  %v53_v15 = vunpack.c.l.b16 %v15_v14  ;;  %v54_v16 = vunpack.c.h.b16 %v15_v14  ;;  %v262_v17 = vld [vmem:[%s385_s1] sm:$0xff] }
   0xc   :  { %v270_v18 = vld [vmem:[%s385_s1 + $0x40] sm:$0xff] }
   0xd   :  { %v55_v19 = vpack.c.b16 %v53_v15, %v53_v15  ;;  %v56_v20 = vpack.c.b16 %v54_v16, %v54_v16  ;;  %v279_v21 = vld [vmem:[%s386_s2] ss:$0 sm:$0xff] }
   0xe   :  { %158 = vmatpush.bf16.msra.mxu0 %v266_v6 }
   0xf   :  { %171 = vmatpush.bf16.msra.mxu1 %v274_v7 }
  0x12   :  { %159 = vmatpush.bf16.msra.mxu0 %v265_v8 }
  0x13   :  { %172 = vmatpush.bf16.msra.mxu1 %v273_v9 }
  0x16   :  { %160 = vmatpush.bf16.msra.mxu0 %v264_v10 }
  0x17   :  { %173 = vmatpush.bf16.msra.mxu1 %v272_v11 }
  0x1a   :  { %161 = vmatpush.bf16.msra.mxu0 %v263_v12 }
  0x1b   :  { %174 = vmatpush.bf16.msra.mxu1 %v271_v13 }
  0x1e   :  { %162 = vmatpush.bf16.msra.mxu0 %v262_v17 }
  0x1f   :  { %175 = vmatpush.bf16.msra.mxu1 %v270_v18 }
  0x21   :  { %163 = vmatmul.bf16.vlgmr.msra.gmra.mxu0 %v55_v19 }
  0x22   :  { %176 = vmatmul.bf16.vlgmr.msra.gmra.mxu1 %v56_v20 }
  0x9e   :  { %v164_v22 = vpop.f32.mrf.mxu0 }
  0x9f   :  { %v177_v23 = vpop.f32.mrf.mxu1  ;;  %v165_v24 = vadd.f32 %v279_v21, %v164_v22 }
  0xa1   :  { %v178_v25 = vadd.f32 %v177_v23, %v165_v24 }
  0xa3   :  { %181 = vst [vmem:[#allocation2] sm:$0xff] %v178_v25 }
  0xa4   :  { %192 = dma.vmem_to_hbm [thread:$0]  %s188_s21, 128, %s190_s24, [#allocation3]  }
  0xa6   :  { %v166_v26 = vpop.f32.mrf.mxu0 }
  0xa7   :  { %v179_v27 = vpop.f32.mrf.mxu1 }
  0xa8   :  { %304 = dma.done.wait [#allocation3], 128  }
  0xa9   :  { %305 = vsyncadd [#allocation3], 4294967168 }
  0xaa   :  { %197 = vsyncpa [#allocation3], 1 }

</bundles_post_ra>
